<compile_context>
chip_gen: v5e
topology: v5e:2x2
jax: 0.10.0
libtpu: 0.0.40
codegen_flags: <defaults>
</compile_context>

<pallas_src>
import functools

import jax
import jax.numpy as jnp
from jax.experimental import pallas as pl
from jax.experimental.pallas import tpu as pltpu


def _round_up(a, b):
    return (a + b - 1) // b * b


def _pick_tile(dim, preferred):
    """Largest tile in `preferred` that divides `dim` (dims are 128-multiples)."""
    for t in preferred:
        if t <= dim and dim % t == 0:
            return t
    return dim


# ---------------------------------------------------------------------------
# Path A: all GCN layers fused into ONE pallas_call (small, single-block case).
# ---------------------------------------------------------------------------
def _make_fused_kernel(num_w):
    def kernel(*refs):
        a_ref, x_ref = refs[0], refs[1]
        w_refs = refs[2:2 + num_w]
        o_ref = refs[2 + num_w]
        a = a_ref[...]
        h = x_ref[...]
        for w_ref in w_refs:
            xw = jnp.dot(h, w_ref[...], preferred_element_type=jnp.float32)
            h = jnp.maximum(
                jnp.dot(a, xw.astype(a.dtype),
                        preferred_element_type=jnp.float32),
                0.0,
            ).astype(o_ref.dtype)
        o_ref[...] = h

    return kernel


def _fused_forward(a_pad, x_pad, w_pads, out_dtype):
    n_pad = a_pad.shape[0]
    h_out_pad = w_pads[-1].shape[1]
    num_w = len(w_pads)

    flops = 0
    bytes_accessed = (a_pad.size + x_pad.size + n_pad * h_out_pad) * 2
    fin = x_pad.shape[1]
    for w in w_pads:
        fo = w.shape[1]
        flops += 2 * n_pad * fin * fo + 2 * n_pad * n_pad * fo
        bytes_accessed += w.size * 2
        fin = fo

    in_specs = (
        [pl.BlockSpec((n_pad, n_pad), lambda i: (0, 0)),
         pl.BlockSpec((n_pad, x_pad.shape[1]), lambda i: (0, 0))]
        + [pl.BlockSpec(w.shape, lambda i: (0, 0)) for w in w_pads]
    )
    return pl.pallas_call(
        _make_fused_kernel(num_w),
        out_shape=jax.ShapeDtypeStruct((n_pad, h_out_pad), out_dtype),
        grid=(1,),
        in_specs=in_specs,
        out_specs=pl.BlockSpec((n_pad, h_out_pad), lambda i: (0, 0)),
        compiler_params=pltpu.CompilerParams(
            dimension_semantics=("arbitrary",),
        ),
        cost_estimate=pl.CostEstimate(
            flops=flops, transcendentals=0, bytes_accessed=bytes_accessed),
    )(a_pad, x_pad, *w_pads)


# ---------------------------------------------------------------------------
# Path B: generic k-tiled matmul (optionally fused ReLU) with f32 accumulator.
# Used per layer as: XW = matmul(H, W);  H_next = matmul_relu(Ahat, XW).
# ---------------------------------------------------------------------------
def _matmul_kernel(a_ref, b_ref, o_ref, acc_ref, *, apply_relu):
    @pl.when(pl.program_id(2) == 0)
    def _():
        acc_ref[...] = jnp.zeros_like(acc_ref)

    acc_ref[...] += jnp.dot(a_ref[...], b_ref[...],
                            preferred_element_type=jnp.float32)

    @pl.when(pl.program_id(2) == pl.num_programs(2) - 1)
    def _():
        h = acc_ref[...]
        if apply_relu:
            h = jnp.maximum(h, 0.0)
        o_ref[...] = h.astype(o_ref.dtype)


def _tiled_matmul(a, b, *, apply_relu, out_dtype):
    M, K = a.shape
    K2, N = b.shape
    assert K == K2
    tm = _pick_tile(M, (512, 256, 128))
    tn = _pick_tile(N, (512, 256, 128))
    tk = _pick_tile(K, (2048, 1024, 512, 256, 128))
    grid = (M // tm, N // tn, K // tk)

    flops = 2 * M * N * K
    bytes_accessed = ((M * K + K * N) * a.dtype.itemsize
                      + M * N * jnp.dtype(out_dtype).itemsize)

    return pl.pallas_call(
        functools.partial(_matmul_kernel, apply_relu=apply_relu),
        out_shape=jax.ShapeDtypeStruct((M, N), out_dtype),
        grid=grid,
        in_specs=[pl.BlockSpec((tm, tk), lambda i, j, k: (i, k)),
                  pl.BlockSpec((tk, tn), lambda i, j, k: (k, j))],
        out_specs=pl.BlockSpec((tm, tn), lambda i, j, k: (i, j)),
        scratch_shapes=[pltpu.VMEM((tm, tn), jnp.float32)],
        compiler_params=pltpu.CompilerParams(
            dimension_semantics=("parallel", "parallel", "arbitrary"),
            vmem_limit_bytes=48 * 1024 * 1024,
        ),
        cost_estimate=pl.CostEstimate(
            flops=flops, transcendentals=0, bytes_accessed=bytes_accessed),
    )(a, b)


# ---------------------------------------------------------------------------
# Driver
# ---------------------------------------------------------------------------
def sp_gcn_forward(Ahat, node_feats, w_list, *, force_tiled=False):
    """Sp_GCN forward: h = relu(Ahat @ (h @ W_i)) for each layer.

    Ahat       : (N, N) float32 dense normalized adjacency
    node_feats : (N, F) float32
    w_list     : list of (F_in, F_out) float32 weights (PyTorch layout: x @ W)
    returns    : (N, F_out_last) float32
    """
    N = Ahat.shape[0]
    assert Ahat.shape == (N, N)
    assert node_feats.shape[0] == N

    n_pad = _round_up(N, 128)
    a_pad = jnp.zeros((n_pad, n_pad), jnp.bfloat16)
    a_pad = a_pad.at[:N, :N].set(Ahat.astype(jnp.bfloat16))

    F = node_feats.shape[1]
    f_pad = _round_up(F, 128)
    h_pad = jnp.zeros((n_pad, f_pad), jnp.bfloat16)
    h_pad = h_pad.at[:N, :F].set(node_feats.astype(jnp.bfloat16))

    # Pad weights; each layer's input dim padded to match previous padded width.
    w_pads = []
    fin_pad = f_pad
    fout = F
    for w in w_list:
        fin, fout = w.shape
        fout_pad = _round_up(fout, 128)
        w_pad = jnp.zeros((fin_pad, fout_pad), jnp.bfloat16)
        w_pad = w_pad.at[:fin, :fout].set(w.astype(jnp.bfloat16))
        w_pads.append(w_pad)
        fin_pad = fout_pad

    max_feat_pad = max([f_pad] + [w.shape[1] for w in w_pads])
    fused_bytes = (n_pad * n_pad + 2 * n_pad * max_feat_pad
                   + sum(w.size for w in w_pads)) * 2

    if (not force_tiled) and n_pad <= 1024 and fused_bytes <= 8 * 1024 * 1024:
        # Launch-overhead-bound regime: one pallas_call for all layers.
        out_pad = _fused_forward(a_pad, h_pad, w_pads, jnp.bfloat16)
    else:
        # Scalable regime: XW hoisted once per layer, k-tiled propagation.
        out_pad = h_pad
        for w_pad in w_pads:
            xw = _tiled_matmul(out_pad, w_pad,
                               apply_relu=False, out_dtype=jnp.bfloat16)
            out_pad = _tiled_matmul(a_pad, xw,
                                    apply_relu=True, out_dtype=jnp.bfloat16)

    return out_pad[:N, :fout].astype(jnp.float32)


def ref_forward(Ahat, node_feats, w_list):
    """Pure-JAX reference with the same bf16-input / f32-accumulate recipe."""
    a = Ahat.astype(jnp.bfloat16)
    h = node_feats.astype(jnp.bfloat16)
    for w in w_list:
        xw = jnp.dot(h, w.astype(jnp.bfloat16),
                     preferred_element_type=jnp.float32).astype(jnp.bfloat16)
        h = jnp.maximum(jnp.dot(a, xw, preferred_element_type=jnp.float32),
                        0.0).astype(jnp.bfloat16)
    return h.astype(jnp.float32)


def _make_inputs(key, N, feats_per_node, layer_feats):
    k_adj, k_x, *k_ws = jax.random.split(key, 2 + len(layer_feats))
    # Dense symmetric-normalized adjacency Ahat = D^-1/2 (A + I) D^-1/2.
    logits = jax.random.uniform(k_adj, (N, N))
    A = (logits + logits.T > 1.2).astype(jnp.float32)
    A = jnp.minimum(A + jnp.eye(N, dtype=jnp.float32), 1.0)
    d_inv_sqrt = 1.0 / jnp.sqrt(A.sum(axis=1))
    Ahat = A * d_inv_sqrt[:, None] * d_inv_sqrt[None, :]

    X = jax.random.normal(k_x, (N, feats_per_node), jnp.float32)

    def init_w(k, fin, fo):
        stdv = 1.0 / (fo ** 0.5)  # u.reset_param-style uniform init
        return jax.random.uniform(k, (fin, fo), jnp.float32,
                                  minval=-stdv, maxval=stdv)

    w_list = []
    fin = feats_per_node
    for k, fo in zip(k_ws, layer_feats):
        w_list.append(init_w(k, fin, fo))
        fin = fo
    return Ahat, X, w_list


if __name__ == "__main__":
    # Shapes implied by the module (small): N nodes, 2 GCN layers.
    N = 16
    feats_per_node = 32
    layer_1_feats = 64
    layer_2_feats = 32

    key = jax.random.PRNGKey(0)
    Ahat, X, w_list = _make_inputs(key, N, feats_per_node,
                                   [layer_1_feats, layer_2_feats])

    # Small-graph fused path (the module's actual regime).
    out = jax.block_until_ready(sp_gcn_forward(Ahat, X, w_list))
    ref = ref_forward(Ahat, X, w_list)
    assert out.shape == (N, layer_2_feats)
    assert jnp.allclose(out, ref, atol=2e-2, rtol=2e-2), \
        float(jnp.max(jnp.abs(out - ref)))

    # Also exercise the scalable k-tiled path on a slightly larger graph.
    Ahat2, X2, w_list2 = _make_inputs(jax.random.PRNGKey(1), 256,
                                      feats_per_node,
                                      [layer_1_feats, layer_2_feats])
    out2 = jax.block_until_ready(
        sp_gcn_forward(Ahat2, X2, w_list2, force_tiled=True))
    ref2 = ref_forward(Ahat2, X2, w_list2)
    assert out2.shape == (256, layer_2_feats)
    assert jnp.allclose(out2, ref2, atol=5e-2, rtol=5e-2), \
        float(jnp.max(jnp.abs(out2 - ref2)))

    print("KERNEL_OK")
</pallas_src>

<mosaic_0001>
module attributes {stable_mosaic.version = 11 : i64} {
  func.func @kernel(%arg0: i32, %arg1: memref<128x128xbf16, #tpu.memory_space<vmem>>, %arg2: memref<128x128xbf16, #tpu.memory_space<vmem>>, %arg3: memref<128x128xbf16, #tpu.memory_space<vmem>>, %arg4: memref<128x128xbf16, #tpu.memory_space<vmem>>, %arg5: memref<128x128xbf16, #tpu.memory_space<vmem>>) attributes {dimension_semantics = [#tpu.dimension_semantics<arbitrary>], iteration_bounds = array<i64: 1>, scalar_prefetch = 0 : i64, scratch_operands = 0 : i64, tpu.core_type = #tpu.core_type<tc>, window_params = [{pipeline_mode = #tpu.pipeline_mode<synchronous>, transform_indices = @transform_0, window_bounds = array<i64: 128, 128>}, {pipeline_mode = #tpu.pipeline_mode<synchronous>, transform_indices = @transform_1, window_bounds = array<i64: 128, 128>}, {pipeline_mode = #tpu.pipeline_mode<synchronous>, transform_indices = @transform_2, window_bounds = array<i64: 128, 128>}, {pipeline_mode = #tpu.pipeline_mode<synchronous>, transform_indices = @transform_3, window_bounds = array<i64: 128, 128>}, {pipeline_mode = #tpu.pipeline_mode<synchronous>, transform_indices = @transform_4, window_bounds = array<i64: 128, 128>}]} {
    %c0 = arith.constant 0 : index
    %c0_0 = arith.constant 0 : index
    %0 = vector.load %arg1[%c0, %c0_0] : memref<128x128xbf16, #tpu.memory_space<vmem>>, vector<128x128xbf16>
    %c0_1 = arith.constant 0 : index
    %c0_2 = arith.constant 0 : index
    %1 = vector.load %arg2[%c0_1, %c0_2] : memref<128x128xbf16, #tpu.memory_space<vmem>>, vector<128x128xbf16>
    %c0_3 = arith.constant 0 : index
    %c0_4 = arith.constant 0 : index
    %2 = vector.load %arg3[%c0_3, %c0_4] : memref<128x128xbf16, #tpu.memory_space<vmem>>, vector<128x128xbf16>
    %cst = arith.constant dense<0.000000e+00> : vector<128x128xf32>
    %3 = tpu.matmul %1, %2, %cst {dimension_numbers = #tpu.dot_dimension_numbers<[1], [0], [0], [1], [0, 0, 1, 1], [], []>} : vector<128x128xbf16>, vector<128x128xbf16>, vector<128x128xf32> -> vector<128x128xf32>
    %4 = arith.truncf %3 : vector<128x128xf32> to vector<128x128xbf16>
    %cst_5 = arith.constant dense<0.000000e+00> : vector<128x128xf32>
    %5 = tpu.matmul %0, %4, %cst_5 {dimension_numbers = #tpu.dot_dimension_numbers<[1], [0], [0], [1], [0, 0, 1, 1], [], []>} : vector<128x128xbf16>, vector<128x128xbf16>, vector<128x128xf32> -> vector<128x128xf32>
    %cst_6 = arith.constant 0.000000e+00 : f32
    %6 = vector.broadcast %cst_6 : f32 to vector<128x128xf32>
    %7 = arith.maximumf %5, %6 : vector<128x128xf32>
    %8 = arith.truncf %7 : vector<128x128xf32> to vector<128x128xbf16>
    %c0_7 = arith.constant 0 : index
    %c0_8 = arith.constant 0 : index
    %9 = vector.load %arg4[%c0_7, %c0_8] : memref<128x128xbf16, #tpu.memory_space<vmem>>, vector<128x128xbf16>
    %cst_9 = arith.constant dense<0.000000e+00> : vector<128x128xf32>
    %10 = tpu.matmul %8, %9, %cst_9 {dimension_numbers = #tpu.dot_dimension_numbers<[1], [0], [0], [1], [0, 0, 1, 1], [], []>} : vector<128x128xbf16>, vector<128x128xbf16>, vector<128x128xf32> -> vector<128x128xf32>
    %11 = arith.truncf %10 : vector<128x128xf32> to vector<128x128xbf16>
    %cst_10 = arith.constant dense<0.000000e+00> : vector<128x128xf32>
    %12 = tpu.matmul %0, %11, %cst_10 {dimension_numbers = #tpu.dot_dimension_numbers<[1], [0], [0], [1], [0, 0, 1, 1], [], []>} : vector<128x128xbf16>, vector<128x128xbf16>, vector<128x128xf32> -> vector<128x128xf32>
    %cst_11 = arith.constant 0.000000e+00 : f32
    %13 = vector.broadcast %cst_11 : f32 to vector<128x128xf32>
    %14 = arith.maximumf %12, %13 : vector<128x128xf32>
    %15 = arith.truncf %14 : vector<128x128xf32> to vector<128x128xbf16>
    %c0_12 = arith.constant 0 : index
    %c0_13 = arith.constant 0 : index
    %16 = vector.load %arg5[%c0_12, %c0_13] : memref<128x128xbf16, #tpu.memory_space<vmem>>, vector<128x128xbf16>
    tpu.vector_store %arg5[%c0_12, %c0_13], %15 {strides = array<i32>} : memref<128x128xbf16, #tpu.memory_space<vmem>>, vector<128x128xbf16>,
    return
  }
  func.func @transform_0(%arg0: i32) -> (i32, i32) {
    %c0_i32 = arith.constant 0 : i32
    %c0_i32_0 = arith.constant 0 : i32
    %c0_i32_1 = arith.constant 0 : i32
    return %c0_i32, %c0_i32_0 : i32, i32
  }
  func.func @transform_1(%arg0: i32) -> (i32, i32) {
    %c0_i32 = arith.constant 0 : i32
    %c0_i32_0 = arith.constant 0 : i32
    %c0_i32_1 = arith.constant 0 : i32
    return %c0_i32, %c0_i32_0 : i32, i32
  }
  func.func @transform_2(%arg0: i32) -> (i32, i32) {
    %c0_i32 = arith.constant 0 : i32
    %c0_i32_0 = arith.constant 0 : i32
    %c0_i32_1 = arith.constant 0 : i32
    return %c0_i32, %c0_i32_0 : i32, i32
  }
  func.func @transform_3(%arg0: i32) -> (i32, i32) {
    %c0_i32 = arith.constant 0 : i32
    %c0_i32_0 = arith.constant 0 : i32
    %c0_i32_1 = arith.constant 0 : i32
    return %c0_i32, %c0_i32_0 : i32, i32
  }
  func.func @transform_4(%arg0: i32) -> (i32, i32) {
    %c0_i32 = arith.constant 0 : i32
    %c0_i32_0 = arith.constant 0 : i32
    %c0_i32_1 = arith.constant 0 : i32
    return %c0_i32, %c0_i32_0 : i32, i32
  }
}

</mosaic_0001>

<bundles_post_ra>
// kernel: tpu_custom_call.1
= control target key start
LH: loop header
LB: loop body
LE: loop exit
PB: predicated region body
PF: predicated region fallthrough
CT: control target
= control target key end

     0   :  { %9 = vsyncpa [#allocation3], 0  ;;  %s1078_s0 = inlined_call_operand.hbm [shape: bf16[128,128], index: 0, kind: input, shape index: {}]   ;;  %s1079_s1 = inlined_call_operand.hbm [shape: bf16[128,128], index: 1, kind: input, shape index: {}]   ;;  %s1080_s2 = inlined_call_operand.hbm [shape: bf16[128,128], index: 2, kind: input, shape index: {}]   ;;  %s1081_s3 = inlined_call_operand.hbm [shape: bf16[128,128], index: 3, kind: input, shape index: {}]   ;;  %s1082_s4 = inlined_call_operand.hbm [shape: bf16[128,128], index: 4, kind: output, shape index: {}]  }
   0x1   :  { %10 = vsyncpa [#allocation6], 0 }
   0x2   :  { %11 = vsyncpa [#allocation9], 0 }
   0x3   :  { %12 = vsyncpa [#allocation4], 0  ;;  %s30_s17 = sshll.u32 %s1079_s1, 4  ;;  %s984_s18 = smov [#allocation5]   ;;  %s31_s17 = int_to_ptr.hbm [resolvable:$true] %s30_s17 }
   0x4   :  { %s32_s19 = sshll.u32 %s984_s18, 4  ;;  %s17_s22 = sshll.u32 %s1078_s0, 4  ;;  %s33_s19 = int_to_ptr.vmem [resolvable:$true] %s32_s19  ;;  %s18_s22 = int_to_ptr.hbm [resolvable:$true] %s17_s22 }
   0x5   :  { %s985_s23 = smov 64   ;;  %s986_s24 = smov 4  }
   0x6   :  { %38 = dma.hbm_to_vmem [thread:$0]  %s31_s17, 1024, %s33_s19, [#allocation6], %s985_s23, %s985_s23, %s986_s24  }
   0x7   :  { %s987_s25 = smov [#allocation2]   ;;  %s43_s1 = sshll.u32 %s1080_s2, 4  ;;  %s44_s1 = int_to_ptr.hbm [resolvable:$true] %s43_s1 }
   0x8   :  { %s19_s26 = sshll.u32 %s987_s25, 4  ;;  %s56_s30 = sshll.u32 %s1081_s3, 4  ;;  %s20_s26 = int_to_ptr.vmem [resolvable:$true] %s19_s26  ;;  %s57_s30 = int_to_ptr.hbm [resolvable:$true] %s56_s30 }
   0x9   :  { %25 = dma.hbm_to_vmem [thread:$0]  %s18_s22, 1024, %s20_s26, [#allocation3], %s985_s23, %s985_s23, %s986_s24  }
   0xa   :  { %s988_s5 = smov [#allocation7]   ;;  %s989_s7 = smov [#allocation8]  }
   0xb   :  { %s45_s6 = sshll.u32 %s988_s5, 4  ;;  %s58_s2 = sshll.u32 %s989_s7, 4  ;;  %s46_s6 = int_to_ptr.vmem [resolvable:$true] %s45_s6  ;;  %s59_s2 = int_to_ptr.vmem [resolvable:$true] %s58_s2 }
   0xc   :  { %51 = dma.hbm_to_vmem [thread:$0]  %s44_s1, 1024, %s46_s6, [#allocation6], %s985_s23, %s985_s23, %s986_s24  }
   0xd   :  { %64 = dma.hbm_to_vmem [thread:$0]  %s57_s30, 1024, %s59_s2, [#allocation9], %s985_s23, %s985_s23, %s986_s24  }
   0xe   :  { %976 = dma.done.wait [#allocation3], 1024  }
   0xf   :  { %977 = vsyncadd [#allocation3], 4294966272 }
  0x10   :  { %978 = dma.done.wait [#allocation6], 2048  }
  0x11   :  { %979 = vsyncadd [#allocation6], 4294965248 }
  0x12   :  { %980 = dma.done.wait [#allocation9], 1024  }
  0x13   :  { %981 = vsyncadd [#allocation9], 4294966272  ;;  %v793_v0 = vld [vmem:[#allocation7 + $0x38] sm:$0xff]  ;;  %v792_v1 = vld [vmem:[#allocation7 + $0x30] sm:$0xff]  ;;  %s990_s3 = smov [#allocation10]   ;;  %s627_s11 = sshll.u32 %s1082_s4, 4  ;;  %s628_s11 = int_to_ptr.hbm [resolvable:$true] %s627_s11 }
  0x14   :  { %225 = vmatpush.bf16.msra.mxu0 %v793_v0  ;;  %v791_v2 = vld [vmem:[#allocation7 + $0x28] sm:$0xff]  ;;  %v790_v3 = vld [vmem:[#allocation7 + $0x20] sm:$0xff]  ;;  %v789_v4 = vld [vmem:[#allocation7 + $0x18] sm:$0xff]  ;;  %s625_s8 = sshll.u32 %s990_s3, 4  ;;  %s626_s8 = int_to_ptr.vmem [resolvable:$true] %s625_s8 }
  0x15   :  { %v788_v5 = vld [vmem:[#allocation7 + $0x10] sm:$0xff]  ;;  %v787_v6 = vld [vmem:[#allocation7 + $0x8] sm:$0xff]  ;;  %v786_v7 = vld [vmem:[#allocation7] sm:$0xff] }
  0x16   :  { %v778_v8 = vld [vmem:[#allocation5] sm:$0xff]  ;;  %v779_v9 = vld [vmem:[#allocation5 + $0x8] sm:$0xff]  ;;  %v780_v10 = vld [vmem:[#allocation5 + $0x10] sm:$0xff] }
  0x17   :  { %v781_v11 = vld [vmem:[#allocation5 + $0x18] sm:$0xff]  ;;  %v782_v12 = vld [vmem:[#allocation5 + $0x20] sm:$0xff]  ;;  %v783_v13 = vld [vmem:[#allocation5 + $0x28] sm:$0xff] }
  0x18   :  { %226 = vmatpush.bf16.msra.mxu0 %v792_v1  ;;  %v784_v14 = vld [vmem:[#allocation5 + $0x30] sm:$0xff]  ;;  %v785_v15 = vld [vmem:[#allocation5 + $0x38] sm:$0xff]  ;;  %v1040_v40 = vld [vmem:[#allocation2] sm:$0xff] }
  0x19   :  { %v1043_v41 = vld [vmem:[#allocation2 + $0x8] sm:$0xff]  ;;  %v1046_v42 = vld [vmem:[#allocation2 + $0x10] sm:$0xff]  ;;  %v1049_v43 = vld [vmem:[#allocation2 + $0x18] sm:$0xff] }
  0x1a   :  { %v1052_v44 = vld [vmem:[#allocation2 + $0x20] sm:$0xff]  ;;  %v801_v45 = vld [vmem:[#allocation8 + $0x38] sm:$0xff]  ;;  %v800_v46 = vld [vmem:[#allocation8 + $0x30] sm:$0xff] }
  0x1b   :  { %467 = vmatpush.bf16.msra.mxu2 %v801_v45  ;;  %v1055_v47 = vld [vmem:[#allocation2 + $0x28] sm:$0xff]  ;;  %v798_v49 = vld [vmem:[#allocation8 + $0x20] sm:$0xff]  ;;  %v797_v50 = vld [vmem:[#allocation8 + $0x18] sm:$0xff] }
  0x1c   :  { %227 = vmatpush.bf16.msra.mxu0 %v791_v2  ;;  %v799_v48 = vld [vmem:[#allocation8 + $0x28] sm:$0xff]  ;;  %v1058_v51 = vld [vmem:[#allocation2 + $0x30] sm:$0xff]  ;;  %v794_v54 = vld [vmem:[#allocation8] sm:$0xff] }
  0x1d   :  { %v796_v52 = vld [vmem:[#allocation8 + $0x10] sm:$0xff]  ;;  %v795_v53 = vld [vmem:[#allocation8 + $0x8] sm:$0xff]  ;;  %v1061_v55 = vld [vmem:[#allocation2 + $0x38] sm:$0xff] }
  0x1f   :  { %468 = vmatpush.bf16.msra.mxu2 %v800_v46 }
  0x20   :  { %228 = vmatpush.bf16.msra.mxu0 %v790_v3 }
  0x23   :  { %469 = vmatpush.bf16.msra.mxu2 %v799_v48 }
  0x24   :  { %229 = vmatpush.bf16.msra.mxu0 %v789_v4 }
  0x27   :  { %470 = vmatpush.bf16.msra.mxu2 %v798_v49 }
  0x28   :  { %230 = vmatpush.bf16.msra.mxu0 %v788_v5 }
  0x2b   :  { %471 = vmatpush.bf16.msra.mxu2 %v797_v50 }
  0x2c   :  { %231 = vmatpush.bf16.msra.mxu0 %v787_v6 }
  0x2f   :  { %472 = vmatpush.bf16.msra.mxu2 %v796_v52 }
  0x30   :  { %232 = vmatpush.bf16.msra.mxu0 %v786_v7 }
  0x33   :  { %233 = vmatmul.bf16.vlgmr.msra.gmra.mxu0 %v778_v8  ;;  %473 = vmatpush.bf16.msra.mxu2 %v795_v53 }
  0x37   :  { %474 = vmatpush.bf16.msra.mxu2 %v794_v54 }
  0x43   :  { %238 = vmatmul.bf16.gmra.mxu0 %v779_v9 }
  0x53   :  { %243 = vmatmul.bf16.gmra.mxu0 %v780_v10 }
  0x63   :  { %248 = vmatmul.bf16.gmra.mxu0 %v781_v11 }
  0x73   :  { %253 = vmatmul.bf16.gmra.mxu0 %v782_v12 }
  0x83   :  { %258 = vmatmul.bf16.gmra.mxu0 %v783_v13 }
  0x93   :  { %263 = vmatmul.bf16.gmra.mxu0 %v784_v14 }
  0xa3   :  { %268 = vmatmul.bf16.gmra.mxu0 %v785_v15 }
  0xb0   :  { %v234_v16 = vpop.f32.mrf.mxu0 }
  0xb8   :  { %v236_v17 = vpop.f32.mrf.mxu0 }
  0xb9   :  { %v274_v18 = vpack.c.bf16 %v236_v17, %v234_v16 }
  0xc0   :  { %v239_v19 = vpop.f32.mrf.mxu0 }
  0xc8   :  { %v241_v20 = vpop.f32.mrf.mxu0 }
  0xc9   :  { %v275_v21 = vpack.c.bf16 %v241_v20, %v239_v19 }
  0xd0   :  { %v244_v22 = vpop.f32.mrf.mxu0 }
  0xd8   :  { %v246_v23 = vpop.f32.mrf.mxu0 }
  0xd9   :  { %v276_v24 = vpack.c.bf16 %v246_v23, %v244_v22 }
  0xe0   :  { %v249_v25 = vpop.f32.mrf.mxu0 }
  0xe8   :  { %v251_v26 = vpop.f32.mrf.mxu0 }
  0xe9   :  { %v277_v27 = vpack.c.bf16 %v251_v26, %v249_v25 }
  0xf0   :  { %v254_v28 = vpop.f32.mrf.mxu0 }
  0xf8   :  { %v256_v29 = vpop.f32.mrf.mxu0 }
  0xf9   :  { %v278_v39 = vpack.c.bf16 %v256_v29, %v254_v28 }
 0x100   :  { %v259_v30 = vpop.f32.mrf.mxu0 }
 0x108   :  { %v261_v31 = vpop.f32.mrf.mxu0 }
 0x109   :  { %v279_v38 = vpack.c.bf16 %v261_v31, %v259_v30 }
 0x110   :  { %v264_v32 = vpop.f32.mrf.mxu0 }
 0x118   :  { %v266_v33 = vpop.f32.mrf.mxu0 }
 0x119   :  { %v280_v37 = vpack.c.bf16 %v266_v33, %v264_v32 }
 0x120   :  { %v269_v34 = vpop.f32.mrf.mxu0 }
 0x128   :  { %v271_v35 = vpop.f32.mrf.mxu0 }
 0x129   :  { %v281_v36 = vpack.c.bf16 %v271_v35, %v269_v34 }
 0x12b   :  { %330 = vmatpush.bf16.msra.mxu1 %v281_v36 }
 0x12f   :  { %331 = vmatpush.bf16.msra.mxu1 %v280_v37 }
 0x133   :  { %332 = vmatpush.bf16.msra.mxu1 %v279_v38 }
 0x137   :  { %333 = vmatpush.bf16.msra.mxu1 %v278_v39 }
 0x13b   :  { %334 = vmatpush.bf16.msra.mxu1 %v277_v27 }
 0x13f   :  { %335 = vmatpush.bf16.msra.mxu1 %v276_v24 }
 0x143   :  { %336 = vmatpush.bf16.msra.mxu1 %v275_v21 }
 0x147   :  { %337 = vmatpush.bf16.msra.mxu1 %v274_v18 }
 0x14a   :  { %338 = vmatmul.bf16.vlgmr.msra.gmra.mxu1 %v1040_v40 }
 0x15a   :  { %343 = vmatmul.bf16.gmra.mxu1 %v1043_v41 }
 0x16a   :  { %348 = vmatmul.bf16.gmra.mxu1 %v1046_v42 }
 0x17a   :  { %353 = vmatmul.bf16.gmra.mxu1 %v1049_v43 }
 0x18a   :  { %358 = vmatmul.bf16.gmra.mxu1 %v1052_v44 }
 0x19a   :  { %363 = vmatmul.bf16.gmra.mxu1 %v1055_v47 }
 0x1aa   :  { %368 = vmatmul.bf16.gmra.mxu1 %v1058_v51 }
 0x1ba   :  { %373 = vmatmul.bf16.gmra.mxu1 %v1061_v55 }
 0x1c7   :  { %v339_v56 = vpop.f32.mrf.mxu1 }
 0x1c8   :  { %v379_v58 = vmax.f32 %v339_v56, 0.0 }
 0x1cf   :  { %v341_v57 = vpop.f32.mrf.mxu1 }
 0x1d0   :  { %v380_v59 = vmax.f32 %v341_v57, 0.0 }
 0x1d2   :  { %v395_v60 = vpack.c.bf16 %v380_v59, %v379_v58 }
 0x1d4   :  { %475 = vmatmul.bf16.vlgmr.msra.gmra.mxu2 %v395_v60 }
 0x1d7   :  { %v344_v61 = vpop.f32.mrf.mxu1 }
 0x1d8   :  { %v381_v63 = vmax.f32 %v344_v61, 0.0 }
 0x1df   :  { %v346_v62 = vpop.f32.mrf.mxu1 }
 0x1e0   :  { %v382_v0 = vmax.f32 %v346_v62, 0.0 }
 0x1e2   :  { %v396_v1 = vpack.c.bf16 %v382_v0, %v381_v63 }
 0x1e4   :  { %480 = vmatmul.bf16.gmra.mxu2 %v396_v1 }
 0x1e7   :  { %v349_v2 = vpop.f32.mrf.mxu1 }
 0x1e8   :  { %v383_v4 = vmax.f32 %v349_v2, 0.0 }
 0x1ef   :  { %v351_v3 = vpop.f32.mrf.mxu1 }
 0x1f0   :  { %v384_v5 = vmax.f32 %v351_v3, 0.0 }
 0x1f2   :  { %v397_v6 = vpack.c.bf16 %v384_v5, %v383_v4 }
 0x1f4   :  { %485 = vmatmul.bf16.gmra.mxu2 %v397_v6 }
 0x1f7   :  { %v354_v7 = vpop.f32.mrf.mxu1 }
 0x1f8   :  { %v385_v9 = vmax.f32 %v354_v7, 0.0 }
 0x1ff   :  { %v356_v8 = vpop.f32.mrf.mxu1 }
 0x200   :  { %v386_v10 = vmax.f32 %v356_v8, 0.0 }
 0x202   :  { %v398_v11 = vpack.c.bf16 %v386_v10, %v385_v9 }
 0x204   :  { %490 = vmatmul.bf16.gmra.mxu2 %v398_v11 }
 0x207   :  { %v359_v12 = vpop.f32.mrf.mxu1 }
 0x208   :  { %v387_v14 = vmax.f32 %v359_v12, 0.0 }
 0x20f   :  { %v361_v13 = vpop.f32.mrf.mxu1 }
 0x210   :  { %v388_v15 = vmax.f32 %v361_v13, 0.0 }
 0x212   :  { %v399_v16 = vpack.c.bf16 %v388_v15, %v387_v14 }
 0x214   :  { %495 = vmatmul.bf16.gmra.mxu2 %v399_v16 }
 0x217   :  { %v364_v17 = vpop.f32.mrf.mxu1 }
 0x218   :  { %v389_v19 = vmax.f32 %v364_v17, 0.0 }
 0x21f   :  { %v366_v18 = vpop.f32.mrf.mxu1 }
 0x220   :  { %v390_v20 = vmax.f32 %v366_v18, 0.0 }
 0x222   :  { %v400_v21 = vpack.c.bf16 %v390_v20, %v389_v19 }
 0x224   :  { %500 = vmatmul.bf16.gmra.mxu2 %v400_v21 }
 0x227   :  { %v369_v22 = vpop.f32.mrf.mxu1 }
 0x228   :  { %v391_v24 = vmax.f32 %v369_v22, 0.0 }
 0x22f   :  { %v371_v23 = vpop.f32.mrf.mxu1 }
 0x230   :  { %v392_v25 = vmax.f32 %v371_v23, 0.0 }
 0x232   :  { %v401_v26 = vpack.c.bf16 %v392_v25, %v391_v24 }
 0x234   :  { %505 = vmatmul.bf16.gmra.mxu2 %v401_v26 }
 0x237   :  { %v374_v27 = vpop.f32.mrf.mxu1 }
 0x238   :  { %v393_v29 = vmax.f32 %v374_v27, 0.0 }
 0x23f   :  { %v376_v28 = vpop.f32.mrf.mxu1 }
 0x240   :  { %v394_v30 = vmax.f32 %v376_v28, 0.0 }
 0x242   :  { %v402_v31 = vpack.c.bf16 %v394_v30, %v393_v29 }
 0x244   :  { %510 = vmatmul.bf16.gmra.mxu2 %v402_v31 }
 0x257   :  { %v476_v32 = vpop.f32.mrf.mxu2 }
 0x25f   :  { %v478_v33 = vpop.f32.mrf.mxu2 }
 0x260   :  { %v516_v34 = vpack.c.bf16 %v478_v33, %v476_v32 }
 0x267   :  { %v481_v35 = vpop.f32.mrf.mxu2 }
 0x26f   :  { %v483_v36 = vpop.f32.mrf.mxu2 }
 0x270   :  { %v517_v37 = vpack.c.bf16 %v483_v36, %v481_v35 }
 0x277   :  { %v486_v38 = vpop.f32.mrf.mxu2 }
 0x27f   :  { %v488_v39 = vpop.f32.mrf.mxu2 }
 0x280   :  { %v518_v45 = vpack.c.bf16 %v488_v39, %v486_v38 }
 0x287   :  { %v491_v46 = vpop.f32.mrf.mxu2 }
 0x28f   :  { %v493_v48 = vpop.f32.mrf.mxu2 }
 0x290   :  { %v519_v49 = vpack.c.bf16 %v493_v48, %v491_v46 }
 0x297   :  { %v496_v50 = vpop.f32.mrf.mxu2 }
 0x29f   :  { %v498_v52 = vpop.f32.mrf.mxu2 }
 0x2a0   :  { %v520_v63 = vpack.c.bf16 %v498_v52, %v496_v50 }
 0x2a7   :  { %v501_v53 = vpop.f32.mrf.mxu2 }
 0x2af   :  { %v503_v54 = vpop.f32.mrf.mxu2 }
 0x2b0   :  { %v521_v62 = vpack.c.bf16 %v503_v54, %v501_v53 }
 0x2b7   :  { %v506_v56 = vpop.f32.mrf.mxu2 }
 0x2bf   :  { %v508_v57 = vpop.f32.mrf.mxu2 }
 0x2c0   :  { %v522_v61 = vpack.c.bf16 %v508_v57, %v506_v56 }
 0x2c7   :  { %v511_v58 = vpop.f32.mrf.mxu2 }
 0x2cf   :  { %v513_v59 = vpop.f32.mrf.mxu2 }
 0x2d0   :  { %v523_v60 = vpack.c.bf16 %v513_v59, %v511_v58 }
 0x2d2   :  { %524 = vmatpush.bf16.msra.mxu3 %v523_v60 }
 0x2d6   :  { %525 = vmatpush.bf16.msra.mxu3 %v522_v61 }
 0x2da   :  { %526 = vmatpush.bf16.msra.mxu3 %v521_v62 }
 0x2de   :  { %527 = vmatpush.bf16.msra.mxu3 %v520_v63 }
 0x2e2   :  { %528 = vmatpush.bf16.msra.mxu3 %v519_v49 }
 0x2e6   :  { %529 = vmatpush.bf16.msra.mxu3 %v518_v45 }
 0x2ea   :  { %530 = vmatpush.bf16.msra.mxu3 %v517_v37 }
 0x2ee   :  { %531 = vmatpush.bf16.msra.mxu3 %v516_v34 }
 0x2f1   :  { %532 = vmatmul.bf16.vlgmr.msra.gmra.mxu3 %v1040_v40 }
 0x301   :  { %537 = vmatmul.bf16.gmra.mxu3 %v1043_v41 }
 0x311   :  { %542 = vmatmul.bf16.gmra.mxu3 %v1046_v42 }
 0x321   :  { %547 = vmatmul.bf16.gmra.mxu3 %v1049_v43 }
 0x331   :  { %552 = vmatmul.bf16.gmra.mxu3 %v1052_v44 }
 0x341   :  { %557 = vmatmul.bf16.gmra.mxu3 %v1055_v47 }
 0x351   :  { %562 = vmatmul.bf16.gmra.mxu3 %v1058_v51 }
 0x361   :  { %567 = vmatmul.bf16.gmra.mxu3 %v1061_v55 }
 0x374   :  { %v533_v0 = vpop.f32.mrf.mxu3 }
 0x375   :  { %v573_v2 = vmax.f32 %v533_v0, 0.0 }
 0x37c   :  { %v535_v1 = vpop.f32.mrf.mxu3 }
 0x37d   :  { %v574_v3 = vmax.f32 %v535_v1, 0.0 }
 0x37f   :  { %v805_v4 = vpack.c.bf16 %v574_v3, %v573_v2 }
 0x381   :  { %806 = vst [vmem:[#allocation10] sm:$0xff] %v805_v4  }
 0x384   :  { %v538_v40 = vpop.f32.mrf.mxu3 }
 0x385   :  { %v575_v5 = vmax.f32 %v538_v40, 0.0 }
 0x38c   :  { %v540_v41 = vpop.f32.mrf.mxu3 }
 0x38d   :  { %v576_v42 = vmax.f32 %v540_v41, 0.0 }
 0x38f   :  { %v810_v6 = vpack.c.bf16 %v576_v42, %v575_v5 }
 0x391   :  { %842 = vst [vmem:[#allocation10 + $0x8] sm:$0xff] %v810_v6  }
 0x394   :  { %v543_v43 = vpop.f32.mrf.mxu3 }
 0x395   :  { %v577_v7 = vmax.f32 %v543_v43, 0.0 }
 0x39c   :  { %v545_v44 = vpop.f32.mrf.mxu3 }
 0x39d   :  { %v578_v47 = vmax.f32 %v545_v44, 0.0 }
 0x39f   :  { %v815_v8 = vpack.c.bf16 %v578_v47, %v577_v7 }
 0x3a1   :  { %843 = vst [vmem:[#allocation10 + $0x10] sm:$0xff] %v815_v8  }
 0x3a4   :  { %v548_v51 = vpop.f32.mrf.mxu3 }
 0x3a5   :  { %v579_v9 = vmax.f32 %v548_v51, 0.0 }
 0x3ac   :  { %v550_v55 = vpop.f32.mrf.mxu3 }
 0x3ad   :  { %v580_v10 = vmax.f32 %v550_v55, 0.0 }
 0x3af   :  { %v820_v11 = vpack.c.bf16 %v580_v10, %v579_v9 }
 0x3b1   :  { %844 = vst [vmem:[#allocation10 + $0x18] sm:$0xff] %v820_v11  }
 0x3b4   :  { %v553_v12 = vpop.f32.mrf.mxu3 }
 0x3b5   :  { %v581_v14 = vmax.f32 %v553_v12, 0.0 }
 0x3bc   :  { %v555_v13 = vpop.f32.mrf.mxu3 }
 0x3bd   :  { %v582_v15 = vmax.f32 %v555_v13, 0.0 }
 0x3bf   :  { %v825_v16 = vpack.c.bf16 %v582_v15, %v581_v14 }
 0x3c1   :  { %845 = vst [vmem:[#allocation10 + $0x20] sm:$0xff] %v825_v16  }
 0x3c4   :  { %v558_v17 = vpop.f32.mrf.mxu3 }
 0x3c5   :  { %v583_v19 = vmax.f32 %v558_v17, 0.0 }
 0x3cc   :  { %v560_v18 = vpop.f32.mrf.mxu3 }
 0x3cd   :  { %v584_v20 = vmax.f32 %v560_v18, 0.0 }
 0x3cf   :  { %v830_v21 = vpack.c.bf16 %v584_v20, %v583_v19 }
 0x3d1   :  { %846 = vst [vmem:[#allocation10 + $0x28] sm:$0xff] %v830_v21  }
 0x3d4   :  { %v563_v22 = vpop.f32.mrf.mxu3 }
 0x3d5   :  { %v585_v24 = vmax.f32 %v563_v22, 0.0 }
 0x3dc   :  { %v565_v23 = vpop.f32.mrf.mxu3 }
 0x3dd   :  { %v586_v25 = vmax.f32 %v565_v23, 0.0 }
 0x3df   :  { %v835_v26 = vpack.c.bf16 %v586_v25, %v585_v24 }
 0x3e1   :  { %847 = vst [vmem:[#allocation10 + $0x30] sm:$0xff] %v835_v26  }
 0x3e4   :  { %v568_v27 = vpop.f32.mrf.mxu3 }
 0x3e5   :  { %v587_v29 = vmax.f32 %v568_v27, 0.0 }
 0x3ec   :  { %v570_v28 = vpop.f32.mrf.mxu3 }
 0x3ed   :  { %v588_v30 = vmax.f32 %v570_v28, 0.0 }
 0x3ef   :  { %v840_v31 = vpack.c.bf16 %v588_v30, %v587_v29 }
 0x3f1   :  { %848 = vst [vmem:[#allocation10 + $0x38] sm:$0xff] %v840_v31  }
 0x3f2   :  { %633 = dma.vmem_to_hbm [thread:$0]  %s626_s8, 1024, %s628_s11, [#allocation4], %s985_s23, %s985_s23, %s986_s24  }
 0x3f3   :  { %982 = dma.done.wait [#allocation4], 1024  }
 0x3f4   :  { %983 = vsyncadd [#allocation4], 4294966272 }
 0x3f5   :  { %638 = vsyncpa [#allocation3], 1 }
 0x3f6   :  { %639 = vsyncpa [#allocation6], 1 }
 0x3f7   :  { %640 = vsyncpa [#allocation9], 1 }
 0x3f8   :  { %641 = vsyncpa [#allocation4], 1 }

</bundles_post_ra>
